<compile_context>
chip_gen: v6e
topology: v6e:2x2x1
jax: 0.10.0
libtpu: 0.0.40
codegen_flags: <defaults>
</compile_context>

<pallas_src>
import math

import jax
import jax.numpy as jnp
from jax.experimental import pallas as pl
from jax.experimental.pallas import tpu as pltpu

_CLAMP = 10000.0
_MIB = 1024 * 1024


def _feature_affine_kernel(x_ref, wb_ref, o_ref):
    # x_ref: (tile_rows, tile_cols); wb_ref: (2, tile_cols), row 0 = weight,
    # row 1 = bias.  Purely VPU elementwise -> HBM-bandwidth bound.
    x = x_ref[...]
    w = wb_ref[0:1, :]
    b = wb_ref[1:2, :]
    y = x * w + b
    lo = jnp.asarray(-_CLAMP, y.dtype)
    hi = jnp.asarray(_CLAMP, y.dtype)
    o_ref[...] = jnp.clip(y, lo, hi).astype(o_ref.dtype)


def _tpu_vmem_bytes() -> int:
    try:
        return int(pltpu.get_tpu_info().vmem_capacity_bytes)
    except Exception:
        return 64 * _MIB  # conservative (v7x-sized) if query unavailable


def _run(x2d: jax.Array, wb: jax.Array, tile_rows: int, tile_cols: int) -> jax.Array:
    R, C = x2d.shape
    itemsize = jnp.dtype(x2d.dtype).itemsize
    block_bytes = tile_rows * tile_cols * itemsize

    phys = _tpu_vmem_bytes()
    # v7x (64 MiB physical): leave headroom, cap at 48 MiB.
    # v5e/v6e (128 MiB physical): allow up to 96 MiB.
    cap = 48 * _MIB if phys <= 64 * _MIB else 96 * _MIB
    # ~2x double-buffered in + out blocks + tiny wb block + headroom.
    # Floor at 32 MiB so v5e's 16 MiB default scoped limit never bites.
    vmem_limit = int(min(cap, max(32 * _MIB, 5 * block_bytes)))

    grid = (pl.cdiv(R, tile_rows), pl.cdiv(C, tile_cols))
    return pl.pallas_call(
        _feature_affine_kernel,
        out_shape=jax.ShapeDtypeStruct((R, C), x2d.dtype),
        grid_spec=pltpu.PrefetchScalarGridSpec(
            num_scalar_prefetch=0,
            grid=grid,
            in_specs=[
                pl.BlockSpec((tile_rows, tile_cols), lambda i, j: (i, j)),
                pl.BlockSpec((2, tile_cols), lambda i, j: (0, j)),  # resident w/b
            ],
            out_specs=pl.BlockSpec((tile_rows, tile_cols), lambda i, j: (i, j)),
        ),
        compiler_params=pltpu.CompilerParams(
            dimension_semantics=("parallel", "parallel"),
            vmem_limit_bytes=vmem_limit,
        ),
    )(x2d, wb)


def _pick_tile_rows(rows: int, row_bytes: int, sub: int, target_bytes: int) -> int:
    """Row tile: sized by bytes, sublane-rounded, and split so grid >= 2 when
    possible (lets v7x shard the parallel axis across both TensorCores)."""
    if rows <= sub:
        return max(rows, 1)  # full-extent block (exempt from (8,128) rule)
    tile_rows = max(sub, (target_bytes // max(row_bytes, 1)) // sub * sub)
    half = pl.cdiv(pl.cdiv(rows, 2), sub) * sub
    tile_rows = min(tile_rows, half)
    tile_rows = min(tile_rows, pl.cdiv(rows, sub) * sub)
    return max(tile_rows, sub)


def feature_affine(x: jax.Array, weight: jax.Array, bias: jax.Array) -> jax.Array:
    """y = clip(x * weight + bias, -1e4, 1e4); x: [..., F], weight/bias: [F]."""
    orig_shape = x.shape
    F_ = orig_shape[-1]
    total = int(x.size)
    dtype = x.dtype
    itemsize = jnp.dtype(dtype).itemsize
    sub = max(8, 32 // itemsize)  # sublane multiple: 8 f32 / 16 bf16 / 32 int8

    weight = weight.astype(dtype)
    bias = bias.astype(dtype)

    if total == 0:
        return jnp.clip(x * weight + bias, -_CLAMP, _CLAMP)

    phys = _tpu_vmem_bytes()
    target_bytes = 4 * _MIB if phys <= 64 * _MIB else 8 * _MIB

    # Lane-dense layout: row width C is a multiple of 128 (unmasked full-lane
    # stores) and a multiple of F (identical tiled weight pattern per row).
    C = math.lcm(F_, 128)
    if C <= 32768:
        rows = pl.cdiv(total, C)
        reps = C // F_
        wb = jnp.stack([jnp.tile(weight, reps), jnp.tile(bias, reps)])
        tile_rows = _pick_tile_rows(rows, C * itemsize, sub, target_bytes)

        if total % C == 0:
            # Fast path: no padding, no trailing slice — reshapes are views.
            x2d = x.reshape(rows, C)
            y2d = _run(x2d, wb, tile_rows, C)
            return y2d.reshape(orig_shape)

        pad = rows * C - total  # at most one row of C
        x2d = jnp.pad(x.reshape(-1), (0, pad)).reshape(rows, C)
        y2d = _run(x2d, wb, tile_rows, C)
        return y2d.reshape(-1)[:total].reshape(orig_shape)

    # Fallback for very large / awkward F: 2-D tiling over (rows, features) so
    # the block (and VMEM) stays bounded; partial edge blocks are masked.
    x2d = x.reshape(-1, F_)
    B = x2d.shape[0]
    wb = jnp.stack([weight, bias])
    tile_cols = min(pl.cdiv(F_, 128) * 128, 8192)
    tile_rows = _pick_tile_rows(B, tile_cols * itemsize, sub, target_bytes)
    y2d = _run(x2d, wb, tile_rows, tile_cols)
    return y2d.reshape(orig_shape)


if __name__ == "__main__":
    key = jax.random.PRNGKey(0)
    k1, k2, k3 = jax.random.split(key, 3)

    # --- check 1: module's intended use (F=32), aligned fast path -----------
    batch, n_feats = 8, 32
    weight = jnp.ones((n_feats,), jnp.float32) + 0.01 * jnp.arange(
        n_feats, dtype=jnp.float32
    )
    bias = jnp.zeros((n_feats,), jnp.float32) + 0.5
    x = jax.random.normal(k1, (batch, n_feats), jnp.float32) * 20000.0

    y = jax.block_until_ready(feature_affine(x, weight, bias))
    y_ref = jnp.clip(x * weight + bias, -10000.0, 10000.0)
    assert y.shape == (batch, n_feats)
    assert jnp.allclose(y, y_ref, atol=1e-5), "mismatch vs reference (F=32)"

    # --- check 2: F that does not divide 128, exercises pad + slice path ----
    b2, f2 = 37, 7
    w2 = 1.0 + 0.1 * jnp.arange(f2, dtype=jnp.float32)
    bi2 = -0.25 * jnp.arange(f2, dtype=jnp.float32)
    x2 = jax.random.normal(k2, (b2, f2), jnp.float32) * 15000.0
    y2 = jax.block_until_ready(feature_affine(x2, w2, bi2))
    y2_ref = jnp.clip(x2 * w2 + bi2, -10000.0, 10000.0)
    assert y2.shape == (b2, f2)
    assert jnp.allclose(y2, y2_ref, atol=1e-5), "mismatch vs reference (F=7)"

    # --- check 3: 3-D input, aligned fast path with feature replication -----
    x3 = jax.random.normal(k3, (2, 4, 64), jnp.float32) * 12000.0
    w3 = 1.0 + 0.02 * jnp.arange(64, dtype=jnp.float32)
    bi3 = 0.1 * jnp.arange(64, dtype=jnp.float32)
    y3 = jax.block_until_ready(feature_affine(x3, w3, bi3))
    y3_ref = jnp.clip(x3 * w3 + bi3, -10000.0, 10000.0)
    assert y3.shape == (2, 4, 64)
    assert jnp.allclose(y3, y3_ref, atol=1e-5), "mismatch vs reference (3-D)"

    print("KERNEL_OK")
</pallas_src>

<mosaic_0001>
module attributes {stable_mosaic.version = 11 : i64} {
  func.func @_feature_affine_kernel(%arg0: i32, %arg1: i32, %arg2: memref<2x128xf32, #tpu.memory_space<vmem>>, %arg3: memref<2x128xf32, #tpu.memory_space<vmem>>, %arg4: memref<2x128xf32, #tpu.memory_space<vmem>>) attributes {dimension_semantics = [#tpu.dimension_semantics<parallel>, #tpu.dimension_semantics<parallel>], iteration_bounds = array<i64: 1, 1>, scalar_prefetch = 0 : i64, scratch_operands = 0 : i64, tpu.core_type = #tpu.core_type<tc>, window_params = [{transform_indices = @transform_0, window_bounds = array<i64: 2, 128>}, {transform_indices = @transform_1, window_bounds = array<i64: 2, 128>}, {transform_indices = @transform_2, window_bounds = array<i64: 2, 128>}]} {
    %c0 = arith.constant 0 : index
    %c0_0 = arith.constant 0 : index
    %0 = vector.load %arg2[%c0, %c0_0] : memref<2x128xf32, #tpu.memory_space<vmem>>, vector<2x128xf32>
    %c0_1 = arith.constant 0 : index
    %c0_2 = arith.constant 0 : index
    %1 = vector.load %arg3[%c0_1, %c0_2] : memref<2x128xf32, #tpu.memory_space<vmem>>, vector<1x128xf32>
    %c1 = arith.constant 1 : index
    %c0_3 = arith.constant 0 : index
    %2 = vector.load %arg3[%c1, %c0_3] : memref<2x128xf32, #tpu.memory_space<vmem>>, vector<1x128xf32>
    %3 = vector.broadcast %1 : vector<1x128xf32> to vector<2x128xf32>
    %4 = arith.mulf %0, %3 : vector<2x128xf32>
    %5 = vector.broadcast %2 : vector<1x128xf32> to vector<2x128xf32>
    %6 = arith.addf %4, %5 : vector<2x128xf32>
    %cst = arith.constant -1.000000e+04 : f32
    %cst_4 = arith.constant 1.000000e+04 : f32
    %7 = vector.broadcast %cst : f32 to vector<2x128xf32>
    %8 = arith.maximumf %7, %6 : vector<2x128xf32>
    %9 = vector.broadcast %cst_4 : f32 to vector<2x128xf32>
    %10 = arith.minimumf %9, %8 : vector<2x128xf32>
    %c0_5 = arith.constant 0 : index
    %c0_6 = arith.constant 0 : index
    %11 = vector.load %arg4[%c0_5, %c0_6] : memref<2x128xf32, #tpu.memory_space<vmem>>, vector<2x128xf32>
    tpu.vector_store %arg4[%c0_5, %c0_6], %10 {strides = array<i32>} : memref<2x128xf32, #tpu.memory_space<vmem>>, vector<2x128xf32>,
    return
  }
  func.func @transform_0(%arg0: i32, %arg1: i32) -> (i32, i32) {
    %c0_i32 = arith.constant 0 : i32
    return %arg0, %arg1 : i32, i32
  }
  func.func @transform_1(%arg0: i32, %arg1: i32) -> (i32, i32) {
    %c0_i32 = arith.constant 0 : i32
    %c0_i32_0 = arith.constant 0 : i32
    return %c0_i32, %arg1 : i32, i32
  }
  func.func @transform_2(%arg0: i32, %arg1: i32) -> (i32, i32) {
    %c0_i32 = arith.constant 0 : i32
    return %arg0, %arg1 : i32, i32
  }
}

</mosaic_0001>

<bundles_post_ra>
// kernel: tpu_custom_call.1
= control target key start
LH: loop header
LB: loop body
LE: loop exit
PB: predicated region body
PF: predicated region fallthrough
CT: control target
= control target key end

     0   :  { %7 = vsyncpa [#allocation3], 0  ;;  %s167_s0 = inlined_call_operand.hbm [shape: f32[2,128], index: 0, kind: input, shape index: {}]   ;;  %s168_s1 = inlined_call_operand.hbm [shape: f32[2,128], index: 1, kind: input, shape index: {}]   ;;  %s169_s2 = inlined_call_operand.hbm [shape: f32[2,128], index: 2, kind: output, shape index: {}]  }
   0x1   :  { %8 = vsyncpa [#allocation6], 0 }
   0x2   :  { %9 = vsyncpa [#allocation4], 0  ;;  %s140_s9 = smov [#allocation2]   ;;  %s141_s11 = smov [#allocation5]  }
   0x3   :  { %s16_s10 = sshll.u32 %s140_s9, 4  ;;  %s26_s12 = sshll.u32 %s141_s11, 4  ;;  %s17_s10 = int_to_ptr.vmem [resolvable:$true] %s16_s10  ;;  %s27_s12 = int_to_ptr.vmem [resolvable:$true] %s26_s12 }
   0x4   :  { %s82_s13 = scalar_lea.vmem %s17_s10, 32  ;;  %p87_p1 = scmp.lt.s32.totalorder %s17_s10, %s17_s10 }
   0x5   :  { %p83_p0 = scmp.ne.s32.totalorder %s17_s10, %s82_s13  ;;  %p88_p2 = scmp.lt.s32.totalorder %s82_s13, %s82_s13 }
   0x7   :  { %p89_p3 = por %p88_p2, %p87_p1 }
   0x9   :  { %p90_p4 = pnand %p89_p3, %p83_p0 }
   0xb   :  { %93 = shalt.err (!%p90_p4)
}
   0xc   :  { %19 = dma.hbm_to_vmem [thread:$0]  %s167_s0, 32, %s17_s10, [#allocation3]  }
   0xd   :  { %s102_s16 = scalar_lea.vmem %s27_s12, 32  ;;  %p107_p6 = scmp.lt.s32.totalorder %s27_s12, %s27_s12 }
   0xe   :  { %p103_p5 = scmp.ne.s32.totalorder %s27_s12, %s102_s16  ;;  %p108_p7 = scmp.lt.s32.totalorder %s102_s16, %s102_s16 }
  0x10   :  { %p109_p8 = por %p108_p7, %p107_p6 }
  0x12   :  { %p110_p9 = pnand %p109_p8, %p103_p5 }
  0x14   :  { %113 = shalt.err (!%p110_p9)
}
  0x15   :  { %29 = dma.hbm_to_vmem [thread:$0]  %s168_s1, 32, %s27_s12, [#allocation6]  }
  0x16   :  { %134 = dma.done.wait [#allocation3], 32  }
  0x17   :  { %135 = vsyncadd [#allocation3], 4294967264 }
  0x18   :  { %136 = dma.done.wait [#allocation6], 32  }
  0x19   :  { %137 = vsyncadd [#allocation6], 4294967264  ;;  %v36_v0 = vld [vmem:[#allocation2] sm:$0x3]  ;;  %v68_v1 = vld [vmem:[#allocation5] ss:$0 sm:$0xff] }
  0x1a   :  { %v69_v2 = vld [vmem:[#allocation5 + $0x1] ss:$0 sm:$0xff]  ;;  %v43_v3 = vmul.f32 %v68_v1, %v36_v0  ;;  %s142_s0 = smov [#allocation7]  }
  0x1b   :  { %s58_s19 = sshll.u32 %s142_s0, 4  ;;  %s59_s19 = int_to_ptr.vmem [resolvable:$true] %s58_s19 }
  0x1c   :  { %v48_v4 = vadd.f32 %v69_v2, %v43_v3  ;;  %s114_s20 = scalar_lea.vmem %s59_s19, 32  ;;  %p119_p11 = scmp.lt.s32.totalorder %s59_s19, %s59_s19 }
  0x1d   :  { %p115_p10 = scmp.ne.s32.totalorder %s59_s19, %s114_s20  ;;  %p120_p12 = scmp.lt.s32.totalorder %s114_s20, %s114_s20 }
  0x1e   :  { %v70_v5 = vclamps-f32 %v48_v4, 10000.0 }
  0x1f   :  { %p121_p13 = por %p120_p12, %p119_p11 }
  0x20   :  { %51 = vst [vmem:[#allocation7] sm:$0x3] %v70_v5 }
  0x21   :  { %p122_p0 = pnand %p121_p13, %p115_p10 }
  0x23   :  { %125 = shalt.err (!%p122_p0)
}
  0x24   :  { %61 = dma.vmem_to_hbm [thread:$0]  %s59_s19, 32, %s169_s2, [#allocation4]  }
  0x25   :  { %138 = dma.done.wait [#allocation4], 32  }
  0x26   :  { %139 = vsyncadd [#allocation4], 4294967264 }
  0x27   :  { %65 = vsyncpa [#allocation3], 1 }
  0x28   :  { %66 = vsyncpa [#allocation6], 1 }
  0x29   :  { %67 = vsyncpa [#allocation4], 1 }

</bundles_post_ra>
